<compile_context>
chip_gen: v5e
topology: v5e:2x2
jax: 0.10.0
libtpu: 0.0.40
codegen_flags: <defaults>
</compile_context>

<pallas_src>
import jax
import jax.numpy as jnp
import numpy as np
from jax.experimental import pallas as pl
from jax.experimental.pallas import tpu as pltpu


# ----------------------------------------------------------------------------
# Forward wrapper + kernels
# ----------------------------------------------------------------------------
def prpe_forward(x_nchw, params, stride=1):
    # TODO(synk): stride > 1 (strided depthwise) not implemented; module default is 1.
    assert stride == 1, "only stride=1 is implemented"
    w1, b1, w2, b2, w3, b3, w4, b4, w5, b5, gamma, beta = params

    N, Cin, H, W = x_nchw.shape
    HW = H * W
    # TODO(synk): support H*W not a multiple of 128 (needs lane padding of the
    # flat spatial axis or masked rolls).
    assert HW % 128 == 0, "H*W must be a multiple of 128 (lane tiling)"
    C2 = w2.shape[1]
    Cout = w5.shape[1]
    C2p = (C2 + 7) // 8 * 8          # pad internal channel dim to sublane count
    pc = C2p - C2

    # ---- one-time parameter preprocessing (pure linear algebra) -------------
    hp_ = "highest"
    w12 = jnp.dot(w1, w2, precision=hp_)                         # (Cin, C2)
    b12 = jnp.dot(b1, w2, precision=hp_) + b2                    # (1, C2)
    w45 = jnp.dot(w4, w5, precision=hp_)                         # (C2, Cout)
    b45 = jnp.dot(b4, w5, precision=hp_) + b5                    # (1, Cout)

    # (out, in) orientation so 1x1 convs are (Cout, Cin) @ (Cin, HW); pad the
    # internal channel dim with zero rows/cols (exact, and gives 8-aligned dims).
    w12_t = jnp.pad(w12.T, ((0, pc), (0, 0))).astype(jnp.bfloat16)        # (C2p, Cin)
    b12_c = jnp.pad(b12.reshape(C2, 1), ((0, pc), (0, 0)))                # (C2p, 1)
    w3_c = jnp.pad(w3.reshape(3, 3, C2, 1), ((0, 0), (0, 0), (0, pc), (0, 0)))
    b3_c = jnp.pad(b3.reshape(C2, 1), ((0, pc), (0, 0)))                  # (C2p, 1)
    w45_t = jnp.pad(w45.T, ((0, 0), (0, pc))).astype(jnp.bfloat16)        # (Cout, C2p)
    b45_c = b45.reshape(Cout, 1)                                          # (Cout, 1)

    # 'same'-padding border-validity masks, one per off-center tap direction.
    # They also kill the wrap-around of the flat-layout lane rolls.  Tiny.
    col = np.arange(HW) % W
    row = np.arange(HW) // W
    masks = jnp.asarray(
        np.stack([col >= 1,          # kx=0 reads x-1
                  col <= W - 2,      # kx=2 reads x+1
                  row >= 1,          # ky=0 reads y-1
                  row <= H - 2],     # ky=2 reads y+1
                 ).astype(np.float32).reshape(4, 1, HW))

    x = x_nchw.reshape(N, Cin, HW).astype(jnp.float32)   # pure view of NCHW

    inv_hw = 1.0 / HW

    # ---- kernel 1: fused conv stack + per-image BN partial stats ------------
    def conv_kernel(x_ref, w12_ref, b12_ref, w3_ref, b3_ref, w45_ref, b45_ref,
                    mask_ref, o_ref, sum_ref, m2_ref):
        # fused conv1+conv2: a 1x1 conv is a channel matmul on the MXU
        # (bf16 operands, f32 accumulation); x stays f32 in HBM, cast in-register.
        xb = x_ref[0].astype(jnp.bfloat16)                             # (Cin, HW)
        h = jnp.dot(w12_ref[...], xb,
                    preferred_element_type=jnp.float32) + b12_ref[...]  # (C2p, HW)

        # depthwise 3x3, padding=1, factored column-then-row: 4 lane rolls total.
        left, right = mask_ref[0], mask_ref[1]                          # (1, HW)
        top, bot = mask_ref[2], mask_ref[3]
        u0 = left * pltpu.roll(h, 1, axis=1)                            # tap x-1
        u2 = right * pltpu.roll(h, HW - 1, axis=1)                      # tap x+1
        acc = u0 * w3_ref[1, 0] + h * w3_ref[1, 1] + u2 * w3_ref[1, 2]
        v0 = u0 * w3_ref[0, 0] + h * w3_ref[0, 1] + u2 * w3_ref[0, 2]
        v2 = u0 * w3_ref[2, 0] + h * w3_ref[2, 1] + u2 * w3_ref[2, 2]
        acc = acc + top * pltpu.roll(v0, W, axis=1)                     # row y-1
        acc = acc + bot * pltpu.roll(v2, HW - W, axis=1)                # row y+1
        h2 = acc + b3_ref[...]

        # fused conv4+conv5 (1x1).
        y = jnp.dot(w45_ref[...], h2.astype(jnp.bfloat16),
                    preferred_element_type=jnp.float32) + b45_ref[...]  # (Cout, HW)

        o_ref[0] = y.astype(o_ref.dtype)

        # per-image BN partials (f32, single in-register pass): sum and
        # *centered* second moment -> robust cross-image combination.
        s = jnp.sum(y, axis=1, keepdims=True)                           # (Cout, 1)
        d = y - s * inv_hw
        sum_ref[0] = s
        m2_ref[0] = jnp.sum(d * d, axis=1, keepdims=True)

    cparams = pltpu.CompilerParams(
        dimension_semantics=("parallel",),
        vmem_limit_bytes=48 * 1024 * 1024,   # headroom under v7x's 64 MiB VMEM
    )

    # TODO(synk): for very large H*W add an H-strip grid axis (+-1-row halo) and
    # fold several images per step so v7x's 2 TensorCores both get work.
    conv_out, psum, pm2 = pl.pallas_call(
        conv_kernel,
        out_shape=(
            jax.ShapeDtypeStruct((N, Cout, HW), jnp.float32),
            jax.ShapeDtypeStruct((N, Cout, 1), jnp.float32),
            jax.ShapeDtypeStruct((N, Cout, 1), jnp.float32),
        ),
        grid_spec=pltpu.PrefetchScalarGridSpec(
            num_scalar_prefetch=0,
            grid=(N,),
            in_specs=[
                pl.BlockSpec((1, Cin, HW), lambda n: (n, 0, 0)),
                pl.BlockSpec((C2p, Cin), lambda n: (0, 0)),
                pl.BlockSpec((C2p, 1), lambda n: (0, 0)),
                pl.BlockSpec((3, 3, C2p, 1), lambda n: (0, 0, 0, 0)),
                pl.BlockSpec((C2p, 1), lambda n: (0, 0)),
                pl.BlockSpec((Cout, C2p), lambda n: (0, 0)),
                pl.BlockSpec((Cout, 1), lambda n: (0, 0)),
                pl.BlockSpec((4, 1, HW), lambda n: (0, 0, 0)),
            ],
            out_specs=[
                pl.BlockSpec((1, Cout, HW), lambda n: (n, 0, 0)),
                pl.BlockSpec((1, Cout, 1), lambda n: (n, 0, 0)),
                pl.BlockSpec((1, Cout, 1), lambda n: (n, 0, 0)),
            ],
        ),
        compiler_params=cparams,
    )(x, w12_t, b12_c, w3_c, b3_c, w45_t, b45_c, masks)

    # ---- combine per-image partials into BN scale/shift (tiny, plain JAX) ---
    # Chan et al. parallel-variance combination: no catastrophic cancellation.
    cnt = jnp.float32(N * HW)
    hw_f = jnp.float32(HW)
    mean = jnp.sum(psum, axis=0) / cnt                         # (Cout, 1)
    mean_i = psum / hw_f                                       # (N, Cout, 1)
    m2 = jnp.sum(pm2, axis=0) + hw_f * jnp.sum((mean_i - mean[None]) ** 2, axis=0)
    var = m2 / cnt                                             # biased (training BN)
    scale = gamma.reshape(Cout, 1) * jax.lax.rsqrt(var + 1e-5)
    shift = beta.reshape(Cout, 1) - mean * scale

    # ---- kernel 2: streaming BN apply, conv_out aliased into the output -----
    # TODO(synk): a bf16 conv_out intermediate would halve this kernel's HBM
    # traffic on v5e/v6e (stats already f32); kept f32 to preserve exact output.
    def bn_apply_kernel(y_ref, scale_ref, shift_ref, o_ref):
        o_ref[0] = (y_ref[0] * scale_ref[...] + shift_ref[...]).astype(o_ref.dtype)

    bn_out = pl.pallas_call(
        bn_apply_kernel,
        out_shape=jax.ShapeDtypeStruct((N, Cout, HW), jnp.float32),
        grid_spec=pltpu.PrefetchScalarGridSpec(
            num_scalar_prefetch=0,
            grid=(N,),
            in_specs=[
                pl.BlockSpec((1, Cout, HW), lambda n: (n, 0, 0)),
                pl.BlockSpec((Cout, 1), lambda n: (0, 0)),
                pl.BlockSpec((Cout, 1), lambda n: (0, 0)),
            ],
            out_specs=pl.BlockSpec((1, Cout, HW), lambda n: (n, 0, 0)),
        ),
        input_output_aliases={0: 0},
        compiler_params=cparams,
    )(conv_out, scale, shift)

    return bn_out.reshape(N, Cout, H, W)                       # NCHW, pure reshape


# ----------------------------------------------------------------------------
# Deterministic parameter init (kaiming-normal-ish, fan_out / relu scaling).
# 1x1 conv weights stored as (Cin, Cout), depthwise as (3, 3, C), biases (1, C).
# ----------------------------------------------------------------------------
def init_params(key, in_ch, out_ch):
    c1 = in_ch // 2
    c2 = int(3 * in_ch / 4)
    c3 = in_ch // 2
    ks = jax.random.split(key, 10)

    def kconv(k, cin, cout):
        std = np.sqrt(2.0 / cout)
        return jax.random.normal(k, (cin, cout), jnp.float32) * std

    def bias(k, c):
        return jax.random.normal(k, (1, c), jnp.float32) * 0.05

    w1, b1 = kconv(ks[0], in_ch, c1), bias(ks[1], c1)
    w2, b2 = kconv(ks[2], c1, c2), bias(ks[3], c2)
    w3 = jax.random.normal(ks[4], (3, 3, c2), jnp.float32) * np.sqrt(2.0 / 9.0)
    b3 = bias(ks[5], c2)
    w4, b4 = kconv(ks[6], c2, c3), bias(ks[7], c3)
    w5, b5 = kconv(ks[8], c3, out_ch), bias(ks[9], out_ch)
    gamma = jnp.ones((1, out_ch), jnp.float32)
    beta = jnp.zeros((1, out_ch), jnp.float32)
    return (w1, b1, w2, b2, w3, b3, w4, b4, w5, b5, gamma, beta)


# ----------------------------------------------------------------------------
# Pure-JAX reference (unfused, f32, mirrors the PyTorch module op-by-op).
# ----------------------------------------------------------------------------
def prpe_reference(x_nchw, params):
    w1, b1, w2, b2, w3, b3, w4, b4, w5, b5, gamma, beta = params
    hp_ = "highest"
    x = jnp.transpose(x_nchw, (0, 2, 3, 1)).astype(jnp.float32)
    h = jnp.einsum('nhwc,cd->nhwd', x, w1, precision=hp_) + b1.reshape(-1)
    h = jnp.einsum('nhwc,cd->nhwd', h, w2, precision=hp_) + b2.reshape(-1)
    N, H, W, C = h.shape
    hp = jnp.pad(h, ((0, 0), (1, 1), (1, 1), (0, 0)))
    acc = jnp.zeros_like(h)
    for ky in range(3):
        for kx in range(3):
            acc = acc + hp[:, ky:ky + H, kx:kx + W, :] * w3[ky, kx]
    h = acc + b3.reshape(-1)
    h = jnp.einsum('nhwc,cd->nhwd', h, w4, precision=hp_) + b4.reshape(-1)
    h = jnp.einsum('nhwc,cd->nhwd', h, w5, precision=hp_) + b5.reshape(-1)
    mean = jnp.mean(h, axis=(0, 1, 2), keepdims=True)
    var = jnp.mean((h - mean) ** 2, axis=(0, 1, 2), keepdims=True)
    out = (h - mean) * jax.lax.rsqrt(var + 1e-5) * gamma.reshape(-1) + beta.reshape(-1)
    return jnp.transpose(out, (0, 3, 1, 2))


if __name__ == "__main__":
    key = jax.random.PRNGKey(0)
    kx, kp = jax.random.split(key)

    N, in_ch, H, W = 2, 8, 16, 16
    out_ch = 8

    x = jax.random.normal(kx, (N, in_ch, H, W), jnp.float32)
    params = init_params(kp, in_ch, out_ch)

    out = jax.block_until_ready(prpe_forward(x, params, stride=1))
    ref = jax.block_until_ready(prpe_reference(x, params))

    # bf16 MXU operands (per the perf review) loosen the match vs the all-f32
    # reference; depthwise, biases and BN statistics remain f32.
    np.testing.assert_allclose(np.asarray(out), np.asarray(ref), rtol=5e-2, atol=5e-2)

    print("KERNEL_OK")
</pallas_src>

<mosaic_0001>
module attributes {stable_mosaic.version = 11 : i64} {
  func.func @conv_kernel(%arg0: i32, %arg1: memref<1x8x256xf32, #tpu.memory_space<vmem>>, %arg2: memref<8x8xbf16, #tpu.memory_space<vmem>>, %arg3: memref<8x1xf32, #tpu.memory_space<vmem>>, %arg4: memref<3x3x8x1xf32, #tpu.memory_space<vmem>>, %arg5: memref<8x1xf32, #tpu.memory_space<vmem>>, %arg6: memref<8x8xbf16, #tpu.memory_space<vmem>>, %arg7: memref<8x1xf32, #tpu.memory_space<vmem>>, %arg8: memref<4x1x256xf32, #tpu.memory_space<vmem>>, %arg9: memref<1x8x256xf32, #tpu.memory_space<vmem>>, %arg10: memref<1x8x1xf32, #tpu.memory_space<vmem>>, %arg11: memref<1x8x1xf32, #tpu.memory_space<vmem>>) attributes {dimension_semantics = [#tpu.dimension_semantics<parallel>], iteration_bounds = array<i64: 2>, scalar_prefetch = 0 : i64, scratch_operands = 0 : i64, tpu.core_type = #tpu.core_type<tc>, window_params = [{transform_indices = @transform_0, window_bounds = array<i64: 1, 8, 256>}, {pipeline_mode = #tpu.pipeline_mode<synchronous>, transform_indices = @transform_1, window_bounds = array<i64: 8, 8>}, {pipeline_mode = #tpu.pipeline_mode<synchronous>, transform_indices = @transform_2, window_bounds = array<i64: 8, 1>}, {pipeline_mode = #tpu.pipeline_mode<synchronous>, transform_indices = @transform_3, window_bounds = array<i64: 3, 3, 8, 1>}, {pipeline_mode = #tpu.pipeline_mode<synchronous>, transform_indices = @transform_4, window_bounds = array<i64: 8, 1>}, {pipeline_mode = #tpu.pipeline_mode<synchronous>, transform_indices = @transform_5, window_bounds = array<i64: 8, 8>}, {pipeline_mode = #tpu.pipeline_mode<synchronous>, transform_indices = @transform_6, window_bounds = array<i64: 8, 1>}, {pipeline_mode = #tpu.pipeline_mode<synchronous>, transform_indices = @transform_7, window_bounds = array<i64: 4, 1, 256>}, {transform_indices = @transform_8, window_bounds = array<i64: 1, 8, 256>}, {transform_indices = @transform_9, window_bounds = array<i64: 1, 8, 1>}, {transform_indices = @transform_10, window_bounds = array<i64: 1, 8, 1>}]} {
    %c0 = arith.constant 0 : index
    %c0_0 = arith.constant 0 : index
    %c0_1 = arith.constant 0 : index
    %0 = vector.load %arg1[%c0, %c0_0, %c0_1] : memref<1x8x256xf32, #tpu.memory_space<vmem>>, vector<1x8x256xf32>
    %1 = vector.shape_cast %0 : vector<1x8x256xf32> to vector<8x256xf32>
    %2 = arith.truncf %1 : vector<8x256xf32> to vector<8x256xbf16>
    %c0_2 = arith.constant 0 : index
    %c0_3 = arith.constant 0 : index
    %3 = vector.load %arg2[%c0_2, %c0_3] : memref<8x8xbf16, #tpu.memory_space<vmem>>, vector<8x8xbf16>
    %cst = arith.constant dense<0.000000e+00> : vector<8x256xf32>
    %4 = tpu.matmul %3, %2, %cst {dimension_numbers = #tpu.dot_dimension_numbers<[1], [0], [0], [1], [0, 0, 1, 1], [], []>} : vector<8x8xbf16>, vector<8x256xbf16>, vector<8x256xf32> -> vector<8x256xf32>
    %c0_4 = arith.constant 0 : index
    %c0_5 = arith.constant 0 : index
    %5 = vector.load %arg3[%c0_4, %c0_5] : memref<8x1xf32, #tpu.memory_space<vmem>>, vector<8x1xf32>
    %6 = vector.broadcast %5 : vector<8x1xf32> to vector<8x256xf32>
    %7 = arith.addf %4, %6 : vector<8x256xf32>
    %c0_6 = arith.constant 0 : index
    %c0_7 = arith.constant 0 : index
    %c0_8 = arith.constant 0 : index
    %8 = vector.load %arg8[%c0_6, %c0_7, %c0_8] : memref<4x1x256xf32, #tpu.memory_space<vmem>>, vector<1x1x256xf32>
    %9 = vector.shape_cast %8 : vector<1x1x256xf32> to vector<1x256xf32>
    %c1 = arith.constant 1 : index
    %c0_9 = arith.constant 0 : index
    %c0_10 = arith.constant 0 : index
    %10 = vector.load %arg8[%c1, %c0_9, %c0_10] : memref<4x1x256xf32, #tpu.memory_space<vmem>>, vector<1x1x256xf32>
    %11 = vector.shape_cast %10 : vector<1x1x256xf32> to vector<1x256xf32>
    %c2 = arith.constant 2 : index
    %c0_11 = arith.constant 0 : index
    %c0_12 = arith.constant 0 : index
    %12 = vector.load %arg8[%c2, %c0_11, %c0_12] : memref<4x1x256xf32, #tpu.memory_space<vmem>>, vector<1x1x256xf32>
    %13 = vector.shape_cast %12 : vector<1x1x256xf32> to vector<1x256xf32>
    %c3 = arith.constant 3 : index
    %c0_13 = arith.constant 0 : index
    %c0_14 = arith.constant 0 : index
    %14 = vector.load %arg8[%c3, %c0_13, %c0_14] : memref<4x1x256xf32, #tpu.memory_space<vmem>>, vector<1x1x256xf32>
    %15 = vector.shape_cast %14 : vector<1x1x256xf32> to vector<1x256xf32>
    %c1_i32 = arith.constant 1 : i32
    %16 = tpu.dynamic_rotate %7 by %c1_i32 dim 1 : vector<8x256xf32>, i32 -> vector<8x256xf32>
    %17 = vector.broadcast %9 : vector<1x256xf32> to vector<8x256xf32>
    %18 = arith.mulf %17, %16 : vector<8x256xf32>
    %c255_i32 = arith.constant 255 : i32
    %19 = tpu.dynamic_rotate %7 by %c255_i32 dim 1 : vector<8x256xf32>, i32 -> vector<8x256xf32>
    %20 = vector.broadcast %11 : vector<1x256xf32> to vector<8x256xf32>
    %21 = arith.mulf %20, %19 : vector<8x256xf32>
    %c1_15 = arith.constant 1 : index
    %c0_16 = arith.constant 0 : index
    %c0_17 = arith.constant 0 : index
    %c0_18 = arith.constant 0 : index
    %22 = vector.load %arg4[%c1_15, %c0_16, %c0_17, %c0_18] : memref<3x3x8x1xf32, #tpu.memory_space<vmem>>, vector<1x1x8x1xf32>
    %23 = vector.shape_cast %22 : vector<1x1x8x1xf32> to vector<8x1xf32>
    %24 = vector.broadcast %23 : vector<8x1xf32> to vector<8x256xf32>
    %25 = arith.mulf %18, %24 : vector<8x256xf32>
    %c1_19 = arith.constant 1 : index
    %c1_20 = arith.constant 1 : index
    %c0_21 = arith.constant 0 : index
    %c0_22 = arith.constant 0 : index
    %26 = vector.load %arg4[%c1_19, %c1_20, %c0_21, %c0_22] : memref<3x3x8x1xf32, #tpu.memory_space<vmem>>, vector<1x1x8x1xf32>
    %27 = vector.shape_cast %26 : vector<1x1x8x1xf32> to vector<8x1xf32>
    %28 = vector.broadcast %27 : vector<8x1xf32> to vector<8x256xf32>
    %29 = arith.mulf %7, %28 : vector<8x256xf32>
    %30 = arith.addf %25, %29 : vector<8x256xf32>
    %c1_23 = arith.constant 1 : index
    %c2_24 = arith.constant 2 : index
    %c0_25 = arith.constant 0 : index
    %c0_26 = arith.constant 0 : index
    %31 = vector.load %arg4[%c1_23, %c2_24, %c0_25, %c0_26] : memref<3x3x8x1xf32, #tpu.memory_space<vmem>>, vector<1x1x8x1xf32>
    %32 = vector.shape_cast %31 : vector<1x1x8x1xf32> to vector<8x1xf32>
    %33 = vector.broadcast %32 : vector<8x1xf32> to vector<8x256xf32>
    %34 = arith.mulf %21, %33 : vector<8x256xf32>
    %35 = arith.addf %30, %34 : vector<8x256xf32>
    %c0_27 = arith.constant 0 : index
    %c0_28 = arith.constant 0 : index
    %c0_29 = arith.constant 0 : index
    %c0_30 = arith.constant 0 : index
    %36 = vector.load %arg4[%c0_27, %c0_28, %c0_29, %c0_30] : memref<3x3x8x1xf32, #tpu.memory_space<vmem>>, vector<1x1x8x1xf32>
    %37 = vector.shape_cast %36 : vector<1x1x8x1xf32> to vector<8x1xf32>
    %38 = vector.broadcast %37 : vector<8x1xf32> to vector<8x256xf32>
    %39 = arith.mulf %18, %38 : vector<8x256xf32>
    %c0_31 = arith.constant 0 : index
    %c1_32 = arith.constant 1 : index
    %c0_33 = arith.constant 0 : index
    %c0_34 = arith.constant 0 : index
    %40 = vector.load %arg4[%c0_31, %c1_32, %c0_33, %c0_34] : memref<3x3x8x1xf32, #tpu.memory_space<vmem>>, vector<1x1x8x1xf32>
    %41 = vector.shape_cast %40 : vector<1x1x8x1xf32> to vector<8x1xf32>
    %42 = vector.broadcast %41 : vector<8x1xf32> to vector<8x256xf32>
    %43 = arith.mulf %7, %42 : vector<8x256xf32>
    %44 = arith.addf %39, %43 : vector<8x256xf32>
    %c0_35 = arith.constant 0 : index
    %c2_36 = arith.constant 2 : index
    %c0_37 = arith.constant 0 : index
    %c0_38 = arith.constant 0 : index
    %45 = vector.load %arg4[%c0_35, %c2_36, %c0_37, %c0_38] : memref<3x3x8x1xf32, #tpu.memory_space<vmem>>, vector<1x1x8x1xf32>
    %46 = vector.shape_cast %45 : vector<1x1x8x1xf32> to vector<8x1xf32>
    %47 = vector.broadcast %46 : vector<8x1xf32> to vector<8x256xf32>
    %48 = arith.mulf %21, %47 : vector<8x256xf32>
    %49 = arith.addf %44, %48 : vector<8x256xf32>
    %c2_39 = arith.constant 2 : index
    %c0_40 = arith.constant 0 : index
    %c0_41 = arith.constant 0 : index
    %c0_42 = arith.constant 0 : index
    %50 = vector.load %arg4[%c2_39, %c0_40, %c0_41, %c0_42] : memref<3x3x8x1xf32, #tpu.memory_space<vmem>>, vector<1x1x8x1xf32>
    %51 = vector.shape_cast %50 : vector<1x1x8x1xf32> to vector<8x1xf32>
    %52 = vector.broadcast %51 : vector<8x1xf32> to vector<8x256xf32>
    %53 = arith.mulf %18, %52 : vector<8x256xf32>
    %c2_43 = arith.constant 2 : index
    %c1_44 = arith.constant 1 : index
    %c0_45 = arith.constant 0 : index
    %c0_46 = arith.constant 0 : index
    %54 = vector.load %arg4[%c2_43, %c1_44, %c0_45, %c0_46] : memref<3x3x8x1xf32, #tpu.memory_space<vmem>>, vector<1x1x8x1xf32>
    %55 = vector.shape_cast %54 : vector<1x1x8x1xf32> to vector<8x1xf32>
    %56 = vector.broadcast %55 : vector<8x1xf32> to vector<8x256xf32>
    %57 = arith.mulf %7, %56 : vector<8x256xf32>
    %58 = arith.addf %53, %57 : vector<8x256xf32>
    %c2_47 = arith.constant 2 : index
    %c2_48 = arith.constant 2 : index
    %c0_49 = arith.constant 0 : index
    %c0_50 = arith.constant 0 : index
    %59 = vector.load %arg4[%c2_47, %c2_48, %c0_49, %c0_50] : memref<3x3x8x1xf32, #tpu.memory_space<vmem>>, vector<1x1x8x1xf32>
    %60 = vector.shape_cast %59 : vector<1x1x8x1xf32> to vector<8x1xf32>
    %61 = vector.broadcast %60 : vector<8x1xf32> to vector<8x256xf32>
    %62 = arith.mulf %21, %61 : vector<8x256xf32>
    %63 = arith.addf %58, %62 : vector<8x256xf32>
    %c16_i32 = arith.constant 16 : i32
    %64 = tpu.dynamic_rotate %49 by %c16_i32 dim 1 : vector<8x256xf32>, i32 -> vector<8x256xf32>
    %65 = vector.broadcast %13 : vector<1x256xf32> to vector<8x256xf32>
    %66 = arith.mulf %65, %64 : vector<8x256xf32>
    %67 = arith.addf %35, %66 : vector<8x256xf32>
    %c240_i32 = arith.constant 240 : i32
    %68 = tpu.dynamic_rotate %63 by %c240_i32 dim 1 : vector<8x256xf32>, i32 -> vector<8x256xf32>
    %69 = vector.broadcast %15 : vector<1x256xf32> to vector<8x256xf32>
    %70 = arith.mulf %69, %68 : vector<8x256xf32>
    %71 = arith.addf %67, %70 : vector<8x256xf32>
    %c0_51 = arith.constant 0 : index
    %c0_52 = arith.constant 0 : index
    %72 = vector.load %arg5[%c0_51, %c0_52] : memref<8x1xf32, #tpu.memory_space<vmem>>, vector<8x1xf32>
    %73 = vector.broadcast %72 : vector<8x1xf32> to vector<8x256xf32>
    %74 = arith.addf %71, %73 : vector<8x256xf32>
    %c0_53 = arith.constant 0 : index
    %c0_54 = arith.constant 0 : index
    %75 = vector.load %arg6[%c0_53, %c0_54] : memref<8x8xbf16, #tpu.memory_space<vmem>>, vector<8x8xbf16>
    %76 = arith.truncf %74 : vector<8x256xf32> to vector<8x256xbf16>
    %cst_55 = arith.constant dense<0.000000e+00> : vector<8x256xf32>
    %77 = tpu.matmul %75, %76, %cst_55 {dimension_numbers = #tpu.dot_dimension_numbers<[1], [0], [0], [1], [0, 0, 1, 1], [], []>} : vector<8x8xbf16>, vector<8x256xbf16>, vector<8x256xf32> -> vector<8x256xf32>
    %c0_56 = arith.constant 0 : index
    %c0_57 = arith.constant 0 : index
    %78 = vector.load %arg7[%c0_56, %c0_57] : memref<8x1xf32, #tpu.memory_space<vmem>>, vector<8x1xf32>
    %79 = vector.broadcast %78 : vector<8x1xf32> to vector<8x256xf32>
    %80 = arith.addf %77, %79 : vector<8x256xf32>
    %c0_58 = arith.constant 0 : index
    %c0_59 = arith.constant 0 : index
    %c0_60 = arith.constant 0 : index
    %81 = vector.load %arg9[%c0_58, %c0_59, %c0_60] : memref<1x8x256xf32, #tpu.memory_space<vmem>>, vector<1x8x256xf32>
    %82 = vector.shape_cast %81 : vector<1x8x256xf32> to vector<8x256xf32>
    %83 = vector.shape_cast %80 : vector<8x256xf32> to vector<1x8x256xf32>
    tpu.vector_store %arg9[%c0_58, %c0_59, %c0_60], %83 {strides = array<i32>} : memref<1x8x256xf32, #tpu.memory_space<vmem>>, vector<1x8x256xf32>,
    %cst_61 = arith.constant dense<0.000000e+00> : vector<8xf32>
    %84 = vector.multi_reduction <add>, %80, %cst_61 [1] : vector<8x256xf32> to vector<8xf32>
    %85 = vector.shape_cast %84 : vector<8xf32> to vector<8x1xf32>
    %cst_62 = arith.constant 3.906250e-03 : f32
    %86 = vector.broadcast %cst_62 : f32 to vector<8x1xf32>
    %87 = arith.mulf %85, %86 : vector<8x1xf32>
    %88 = vector.broadcast %87 : vector<8x1xf32> to vector<8x256xf32>
    %89 = arith.subf %80, %88 : vector<8x256xf32>
    %c0_63 = arith.constant 0 : index
    %c0_64 = arith.constant 0 : index
    %c0_65 = arith.constant 0 : index
    %90 = vector.load %arg10[%c0_63, %c0_64, %c0_65] : memref<1x8x1xf32, #tpu.memory_space<vmem>>, vector<1x8x1xf32>
    %91 = vector.shape_cast %90 : vector<1x8x1xf32> to vector<8x1xf32>
    %92 = vector.shape_cast %85 : vector<8x1xf32> to vector<1x8x1xf32>
    tpu.vector_store %arg10[%c0_63, %c0_64, %c0_65], %92 {strides = array<i32>} : memref<1x8x1xf32, #tpu.memory_space<vmem>>, vector<1x8x1xf32>,
    %93 = arith.mulf %89, %89 : vector<8x256xf32>
    %cst_66 = arith.constant dense<0.000000e+00> : vector<8xf32>
    %94 = vector.multi_reduction <add>, %93, %cst_66 [1] : vector<8x256xf32> to vector<8xf32>
    %95 = vector.shape_cast %94 : vector<8xf32> to vector<8x1xf32>
    %c0_67 = arith.constant 0 : index
    %c0_68 = arith.constant 0 : index
    %c0_69 = arith.constant 0 : index
    %96 = vector.load %arg11[%c0_67, %c0_68, %c0_69] : memref<1x8x1xf32, #tpu.memory_space<vmem>>, vector<1x8x1xf32>
    %97 = vector.shape_cast %96 : vector<1x8x1xf32> to vector<8x1xf32>
    %98 = vector.shape_cast %95 : vector<8x1xf32> to vector<1x8x1xf32>
    tpu.vector_store %arg11[%c0_67, %c0_68, %c0_69], %98 {strides = array<i32>} : memref<1x8x1xf32, #tpu.memory_space<vmem>>, vector<1x8x1xf32>,
    return
  }
  func.func @transform_0(%arg0: i32) -> (i32, i32, i32) {
    %c0_i32 = arith.constant 0 : i32
    %c0_i32_0 = arith.constant 0 : i32
    %c0_i32_1 = arith.constant 0 : i32
    return %arg0, %c0_i32, %c0_i32_0 : i32, i32, i32
  }
  func.func @transform_1(%arg0: i32) -> (i32, i32) {
    %c0_i32 = arith.constant 0 : i32
    %c0_i32_0 = arith.constant 0 : i32
    %c0_i32_1 = arith.constant 0 : i32
    return %c0_i32, %c0_i32_0 : i32, i32
  }
  func.func @transform_2(%arg0: i32) -> (i32, i32) {
    %c0_i32 = arith.constant 0 : i32
    %c0_i32_0 = arith.constant 0 : i32
    %c0_i32_1 = arith.constant 0 : i32
    return %c0_i32, %c0_i32_0 : i32, i32
  }
  func.func @transform_3(%arg0: i32) -> (i32, i32, i32, i32) {
    %c0_i32 = arith.constant 0 : i32
    %c0_i32_0 = arith.constant 0 : i32
    %c0_i32_1 = arith.constant 0 : i32
    %c0_i32_2 = arith.constant 0 : i32
    %c0_i32_3 = arith.constant 0 : i32
    return %c0_i32, %c0_i32_0, %c0_i32_1, %c0_i32_2 : i32, i32, i32, i32
  }
  func.func @transform_4(%arg0: i32) -> (i32, i32) {
    %c0_i32 = arith.constant 0 : i32
    %c0_i32_0 = arith.constant 0 : i32
    %c0_i32_1 = arith.constant 0 : i32
    return %c0_i32, %c0_i32_0 : i32, i32
  }
  func.func @transform_5(%arg0: i32) -> (i32, i32) {
    %c0_i32 = arith.constant 0 : i32
    %c0_i32_0 = arith.constant 0 : i32
    %c0_i32_1 = arith.constant 0 : i32
    return %c0_i32, %c0_i32_0 : i32, i32
  }
  func.func @transform_6(%arg0: i32) -> (i32, i32) {
    %c0_i32 = arith.constant 0 : i32
    %c0_i32_0 = arith.constant 0 : i32
    %c0_i32_1 = arith.constant 0 : i32
    return %c0_i32, %c0_i32_0 : i32, i32
  }
  func.func @transform_7(%arg0: i32) -> (i32, i32, i32) {
    %c0_i32 = arith.constant 0 : i32
    %c0_i32_0 = arith.constant 0 : i32
    %c0_i32_1 = arith.constant 0 : i32
    %c0_i32_2 = arith.constant 0 : i32
    return %c0_i32, %c0_i32_0, %c0_i32_1 : i32, i32, i32
  }
  func.func @transform_8(%arg0: i32) -> (i32, i32, i32) {
    %c0_i32 = arith.constant 0 : i32
    %c0_i32_0 = arith.constant 0 : i32
    %c0_i32_1 = arith.constant 0 : i32
    return %arg0, %c0_i32, %c0_i32_0 : i32, i32, i32
  }
  func.func @transform_9(%arg0: i32) -> (i32, i32, i32) {
    %c0_i32 = arith.constant 0 : i32
    %c0_i32_0 = arith.constant 0 : i32
    %c0_i32_1 = arith.constant 0 : i32
    return %arg0, %c0_i32, %c0_i32_0 : i32, i32, i32
  }
  func.func @transform_10(%arg0: i32) -> (i32, i32, i32) {
    %c0_i32 = arith.constant 0 : i32
    %c0_i32_0 = arith.constant 0 : i32
    %c0_i32_1 = arith.constant 0 : i32
    return %arg0, %c0_i32, %c0_i32_0 : i32, i32, i32
  }
}

</mosaic_0001>

<bundles_post_ra>
// kernel: tpu_custom_call.1
= control target key start
LH: loop header
LB: loop body
LE: loop exit
PB: predicated region body
PF: predicated region fallthrough
CT: control target
= control target key end

     0   :  { %s1180_s0 = inlined_call_operand.vmem [shape: f32[2,8,256], index: 0, kind: input, shape index: {}]   ;;  %s1181_s1 = inlined_call_operand.vmem [shape: bf16[8,8], index: 1, kind: input, shape index: {}]   ;;  %s1182_s2 = inlined_call_operand.vmem [shape: f32[8,1], index: 2, kind: input, shape index: {}]   ;;  %s1183_s3 = inlined_call_operand.vmem [shape: f32[3,3,8,1], index: 3, kind: input, shape index: {}]   ;;  %s1184_s4 = inlined_call_operand.vmem [shape: f32[8,1], index: 4, kind: input, shape index: {}]   ;;  %s1185_s5 = inlined_call_operand.vmem [shape: bf16[8,8], index: 5, kind: input, shape index: {}]   ;;  %s1186_s6 = inlined_call_operand.vmem [shape: f32[8,1], index: 6, kind: input, shape index: {}]   ;;  %s1187_s7 = inlined_call_operand.vmem [shape: f32[4,1,256], index: 7, kind: input, shape index: {}]   ;;  %s1188_s8 = inlined_call_operand.hbm [shape: f32[2,8,256], index: 8, kind: output, shape index: {0}]   ;;  %s1189_s9 = inlined_call_operand.vmem [shape: f32[2,8,1], index: 9, kind: output, shape index: {1}]   ;;  %s1190_s10 = inlined_call_operand.vmem [shape: f32[2,8,1], index: 10, kind: output, shape index: {2}]  }
   0x1   :  { %1191 = sst [smem:[#allocation5_spill]] %s1180_s0 }
   0x2   :  { %1192 = sst [smem:[#allocation6_spill]] %s1181_s1 }
   0x3   :  { %1193 = sst [smem:[#allocation7_spill]] %s1182_s2 }
   0x4   :  { %1194 = sst [smem:[#allocation8_spill]] %s1183_s3 }
   0x5   :  { %1195 = sst [smem:[#allocation9_spill]] %s1184_s4 }
   0x6   :  { %16 = vsyncpa [#allocation3], 0 }
   0x7   :  { %18 = vsyncpa [#allocation3 + $0x1], 0  ;;  %s997_s13 = smov 0   ;;  %s999_s14 = smov 0  }
   0x8   :  { %s1001_s15 = smov 0   ;;  %s1003_s16 = smov 0  }
   0x9 LB: > { %s1018_s17 = sadd.s32 4294967295, %s935_s16   ;;  %s795_s18 = sadd.s32 4294967294, %s935_s16   ;;  %s935_s16 = sphi %s1003_s16, %s1206_s16   ;;  %s931_s15 = sphi %s1001_s15, %s1205_s15   ;;  %s927_s14 = sphi %s999_s14, %s1204_s14   ;;  %s923_s13 = sphi %s997_s13, %s1203_s13  }
   0xa   : > { %s1022_s19 = sadd.s32 1, %s935_s16   ;;  %s204_s20 = sadd.s32 1, %s931_s15 }
   0xb   : > { %s201_s21 = ssub.s32 %s935_s16, %s1022_s19  ;;  %p214_p0 = scmp.ne.s32.totalorder %s931_s15, %s927_s14 }
   0xc   : > { %p202_p1 = scmp.eq.s32.totalorder %s201_s21, 0  ;;  %p215_p2 = scmp.eq.s32.totalorder %s1018_s17, 1 }
   0xd   : > { %p220_p3 = scmp.ne.s32.totalorder %s927_s14, %s923_s13  ;;  %p221_p4 = scmp.eq.s32.totalorder %s795_s18, 1 }
   0xe   : > { %s1033_s22 = scalar_select %p202_p1, %s931_s15, %s204_s20  }
   0xf   : > { %p1035_p5 = por %p215_p2, %p214_p0  ;;  %p1039_p6 = por %p221_p4, %p220_p3 }
  0x10   : > { %p798_p7 = scmp.ge.s32.totalorder %s935_s16, 1  ;;  %p320_p8 = scmp.lt.s32.totalorder %s935_s16, 3 }
  0x12   : > { %p321_p9 = pnand %p798_p7, %p320_p8 }
  0x13   : > { %p366_p10 = scmp.lt.s32.totalorder (!%p321_p9), %s1018_s17, 1  ;;  %s1198_s2 = sld [smem:[#allocation7_spill]] (!%p321_p9) }
  0x14   : > { %324 = sbr.rel (%p321_p9) target bundleno = 805 (0x325), region = 52  ;;  %s1199_s0 = sld [smem:[#allocation5_spill]] (!%p321_p9) }
  0x15   : > { %s1200_s3 = sld [smem:[#allocation8_spill]] (!%p321_p9)  ;;  %s938_s30 = smov (!%p321_p9), 127  }
  0x16   : > { %s1201_s1 = sld [smem:[#allocation6_spill]] (!%p321_p9)  ;;  %s940_s25 = smov (!%p321_p9), 16  }
  0x17   : > { %s941_s26 = smov (!%p321_p9), 112   ;;  %s1202_s4 = sld [smem:[#allocation9_spill]] (!%p321_p9) }
  0x18   : > { %s825_s12 = sshll.u32 (!%p321_p9), %s1018_s17, 4 }
  0x19   : > { %v937_v0 = vmov 0   ;;  %v385_v1 = vld [vmem:[%s1198_s2] sm:$0xff]  ;;  %s1050_s27 = scalar_select %p366_p10, %s1018_s17, 1  ;;  %vm395_vm0 = vcmask 1043456   ;;  %vm391_vm1 = vcmask 64512   ;;  %v439_v26 = vlaneseq }
  0x1a   : > { %870 = vset.pattern.permute.xlu0 %v937_v0  ;;  %872 = vset.pattern.permute.xlu1 %v937_v0  ;;  %v428_v30 = vld [vmem:[%s1187_s7] sm:$0x3]  ;;  %v806_v37 = vld [vmem:[%s1187_s7 + $0x2] sm:$0x3]  ;;  %vm649_vm6 = vcmask 7168  }
  0x1b   : > { %388 = vperm.xlu0 %870, %v385_v1   ;;  %871 = vset.pattern.permute.xlu2 %v937_v0  ;;  %s824_s28 = sshll.u32 %s1050_s27, 4  ;;  %v812_v6 = vld [vmem:[%s1200_s3 + $0x8] sm:$0xff]  ;;  %v813_v10 = vld [vmem:[%s1200_s3 + $0x10] sm:$0xff]  ;;  %v496_v11 = vld [vmem:[%s1200_s3] sm:$0xff]  ;;  %v1098_v29 = vand.u32 127, %v439_v26  ;;  %v445_v32 = vperm.slane %v428_v30, 0 }
  0x1c   : > { %s370_s11 = scalar_lea.vmem %s1199_s0, %s824_s28  ;;  %v384_v9 = vld [vmem:[%s1201_s1] sm:$0xf]  ;;  %519 = vperm.xlu1 %872, %v813_v10   ;;  %499 = vperm.xlu2 %871, %v496_v11   ;;  %v814_v19 = vld [vmem:[%s1200_s3 + $0x30] sm:$0xff]  ;;  %v815_v20 = vld [vmem:[%s1200_s3 + $0x38] sm:$0xff]  ;;  %v446_v33 = vperm.slane %v428_v30, 1  ;;  %v459_v41 = vperm.slane %v806_v37, 0 }
  0x1d   : > { %v380_v2 = vld [vmem:[%s370_s11] sm:$0xff]  ;;  %v381_v3 = vld [vmem:[%s370_s11 + $0x8] sm:$0xff]  ;;  %s939_s11 = smov 1   ;;  %v809_v22 = vld [vmem:[%s1200_s3 + $0x18] sm:$0xff]  ;;  %vm441_vm2 = vcmp.lt.s32.totalorder %v1098_v29, 1  ;;  %vm455_vm3 = vcmp.lt.s32.totalorder %v1098_v29, 127 }
  0x1e   : > { %v382_v4 = vpack.c.bf16 %v380_v2, %v380_v2  ;;  %v383_v5 = vpack.c.bf16 %v381_v3, %v381_v3  ;;  %v816_v21 = vld [vmem:[%s1200_s3 + $0x40] sm:$0xff]  ;;  %v811_v24 = vld [vmem:[%s1200_s3 + $0x28] sm:$0xff]  ;;  %v460_v42 = vperm.slane %v806_v37, 1  ;;  %vm561_vm4 = vcmp.lt.s32.totalorder %v1098_v29, 16 }
  0x1f   : > { %v810_v23 = vld [vmem:[%s1200_s3 + $0x20] sm:$0xff]  ;;  %vm577_vm5 = vcmp.lt.s32.totalorder %v1098_v29, 112 }
  0x20   : > { %v397_v7 = vsel %vm395_vm0, %v382_v4, 0  ;;  %v400_v8 = vsel %vm395_vm0, %v383_v5, 0 }
  0x21   : > { %409 = vmatpush.bf16.msra.mxu0 %v397_v7  ;;  %422 = vmatpush.bf16.msra.mxu1 %v400_v8 }
  0x23   : > { %508 = vperm.xlu0 %870, %v812_v6  }
  0x24   : > { %804 = vmatmul.msk.bf16.vlgmr.msra.gmra.mxu0 %vm391_vm1, %v384_v9  ;;  %805 = vmatmul.msk.bf16.vlgmr.msra.gmra.mxu1 %vm391_vm1, %v384_v9  ;;  %v589_v9 = vld [vmem:[%s1202_s4] sm:$0xff] }
  0x76   : > { %v500_v28 = vpop.permute.xlu2 %499 }
  0x8d   : > { %v389_v12 = vpop.permute.xlu0 %388 }
  0x8e   : > { %v520_v25 = vpop.permute.xlu1 %519 }
  0x95   : > { %v509_v27 = vpop.permute.xlu0 %508 }
  0xa1   : > { %v411_v13 = vpop.f32.mrf.mxu0  ;;  %v424_v14 = vpop.f32.mrf.mxu1 }
  0xa2   : > { %v1072_v15 = vadd.f32 %v411_v13, %v389_v12  ;;  %v1074_v16 = vadd.f32 %v424_v14, %v389_v12 }
  0xa4   : > { %453 = vrot.lane.b32.xlu2 %v1074_v16, %s938_s30  ;;  %437 = vrot.lane.b32.xlu1 %v1074_v16, %s939_s11  ;;  %v512_v51 = vmul.f32 %v509_v27, %v1074_v16  ;;  %v511_v52 = vmul.f32 %v509_v27, %v1072_v15  ;;  %v808_v27 = vld [vmem:[%s1187_s7 + $0x6] sm:$0x3] }
  0xa5   : > { %435 = vrot.lane.b32.xlu0 %v1072_v15, %s939_s11  ;;  %s802_s11 = sshll.u32 %s1050_s27, 3 }
  0xa6   : > { %s374_s20 = scalar_lea.vmem %s1189_s9, %s802_s11 }
  0xa9   : > { %v413_v17 = vpop.f32.mrf.mxu0  ;;  %v426_v18 = vpop.f32.mrf.mxu1 }
  0xac   : > { %451 = vrot.lane.b32.xlu1 %v1072_v15, %s938_s30  ;;  %530 = vperm.xlu2 %871, %v814_v19   ;;  %s893_s30 = scalar_lea.hbm %s1188_s8, 32 }
  0xad   : > { %539 = vperm.xlu0 %870, %v815_v20  }
  0xb4   : > { %550 = vperm.xlu1 %872, %v816_v21   ;;  %469 = vperm.xlu2 %871, %v809_v22  }
  0xb5   : > { %478 = vperm.xlu0 %870, %v810_v23   ;;  %v807_v23 = vld [vmem:[%s1187_s7 + $0x4] sm:$0x3] }
  0xbc   : > { %489 = vperm.xlu1 %872, %v811_v24   ;;  %v565_v24 = vperm.slane %v807_v23, 0 }
  0xfe   : > { %v454_v38 = vpop.permute.xlu2 %453 }
 0x106   : > { %v531_v53 = vpop.permute.xlu2 %530 }
 0x10e   : > { %v470_v10 = vpop.permute.xlu2 %469 }
 0x116   : > { %v438_v31 = vpop.permute.xlu1 %437 }
 0x117   : > { %v436_v34 = vpop.permute.xlu0 %435 }
 0x118   : > { %v442_v35 = vsel %vm441_vm2, %v436_v34, %v438_v31  ;;  %v443_v36 = vsel %vm441_vm2, %v438_v31, %v436_v34  ;;  %v582_v34 = vperm.slane %v808_v27, 1 }
 0x119   : > { %v449_v39 = vmul.f32 %v445_v32, %v443_v36  ;;  %v450_v40 = vmul.f32 %v446_v33, %v442_v35  ;;  %v581_v33 = vperm.slane %v808_v27, 0 }
 0x11b   : > { %v502_v43 = vmul.f32 %v500_v28, %v449_v39  ;;  %v503_v44 = vmul.f32 %v500_v28, %v450_v40  ;;  %v533_v61 = vmul.f32 %v531_v53, %v449_v39  ;;  %v534_v2 = vmul.f32 %v531_v53, %v450_v40 }
 0x11c   : > { %v472_v12 = vmul.f32 %v470_v10, %v449_v39  ;;  %v473_v13 = vmul.f32 %v470_v10, %v450_v40 }
 0x11d   : > { %v514_v54 = vadd.f32 %v512_v51, %v503_v44  ;;  %v513_v56 = vadd.f32 %v511_v52, %v502_v43  ;;  %v597_v51 = vld [vmem:[%s1185_s5] sm:$0xf] }
 0x11e   : > { %v452_v45 = vpop.permute.xlu1 %451 }
 0x11f   : > { %v456_v46 = vsel %vm455_vm3, %v452_v45, %v454_v38  ;;  %v457_v47 = vsel %vm455_vm3, %v454_v38, %v452_v45  ;;  %v540_v48 = vpop.permute.xlu0 %539 }
 0x120   : > { %v463_v49 = vmul.f32 %v459_v41, %v456_v46  ;;  %v464_v50 = vmul.f32 %v460_v42, %v457_v47  ;;  %v542_v58 = vmul.f32 %v540_v48, %v1072_v15  ;;  %v543_v62 = vmul.f32 %v540_v48, %v1074_v16 }
 0x122   : > { %v523_v55 = vmul.f32 %v520_v25, %v464_v50  ;;  %v522_v57 = vmul.f32 %v520_v25, %v463_v49  ;;  %v544_v0 = vadd.f32 %v542_v58, %v533_v61  ;;  %v545_v6 = vadd.f32 %v543_v62, %v534_v2 }
 0x123   : > { %v566_v25 = vperm.slane %v807_v23, 1 }
 0x124   : > { %v525_v59 = vadd.f32 %v523_v55, %v514_v54  ;;  %v524_v60 = vadd.f32 %v522_v57, %v513_v56 }
 0x126   : > { %v551_v63 = vpop.permute.xlu1 %550  ;;  %559 = vrot.lane.b32.xlu0 %v525_v59, %s940_s25  ;;  %557 = vrot.lane.b32.xlu2 %v524_v60, %s940_s25  ;;  %s677_s25 = scalar_lea.hbm %s1188_s8, %s825_s12 }
 0x127   : > { %v553_v1 = vmul.f32 %v551_v63, %v463_v49  ;;  %v554_v3 = vmul.f32 %v551_v63, %v464_v50  ;;  %v479_v4 = vpop.permute.xlu0 %478 }
 0x128   : > { %v481_v7 = vmul.f32 %v479_v4, %v1072_v15  ;;  %v482_v8 = vmul.f32 %v479_v4, %v1074_v16  ;;  %v600_v15 = vld [vmem:[%s1186_s6] sm:$0xff] }
 0x129   : > { %v555_v5 = vadd.f32 %v553_v1, %v544_v0  ;;  %v556_v11 = vadd.f32 %v554_v3, %v545_v6 }
 0x12a   : > { %v483_v17 = vadd.f32 %v481_v7, %v472_v12  ;;  %v484_v18 = vadd.f32 %v482_v8, %v473_v13 }
 0x12b   : > { %573 = vrot.lane.b32.xlu1 %v555_v5, %s941_s26 }
 0x12e   : > { %v490_v14 = vpop.permute.xlu1 %489  ;;  %592 = vperm.xlu0 %870, %v589_v9   ;;  %575 = vrot.lane.b32.xlu2 %v556_v11, %s941_s26  ;;  %s351_s26 = sand.u32 1, %s927_s14  }
 0x12f   : > { %v492_v19 = vmul.f32 %v490_v14, %v463_v49  ;;  %v493_v20 = vmul.f32 %v490_v14, %v464_v50  ;;  %s799_s28 = sshll.u32 %s351_s26, 4  ;;  %s658_s2 = scalar_lea.sflag [#allocation3], %s351_s26 }
 0x130   : > { %s353_s29 = scalar_lea.vmem [#allocation2], %s799_s28  ;;  %s681_s28 = sshll.u32 %s677_s25, 4  ;;  %s682_s28 = int_to_ptr.hbm [resolvable:$true] %s681_s28 }
 0x131   : > { %v494_v16 = vadd.f32 %v492_v19, %v483_v17  ;;  %v495_v21 = vadd.f32 %v493_v20, %v484_v18  ;;  %s679_s1 = sshll.u32 %s353_s29, 4  ;;  %s887_s3 = sshra.s32 %s682_s28, 4  ;;  %s680_s1 = int_to_ptr.vmem [resolvable:$true] %s679_s1  ;;  %s888_s3 = int_to_ptr.hbm [resolvable:$true] %s887_s3 }
 0x132   : > { %s889_s4 = scalar_lea.hbm %s888_s3, 16  ;;  %p894_p0 = scmp.lt.s32.totalorder %s888_s3, %s1188_s8 }
 0x133   : > { %603 = vperm.xlu1 %872, %v600_v15   ;;  %p890_p11 = scmp.ne.s32.totalorder %s888_s3, %s889_s4  ;;  %p895_p1 = scmp.lt.s32.totalorder %s893_s30, %s889_s4 }
 0x135   : > { %p891_p12 = pnand %p890_p11, %p1035_p5  ;;  %p896_p2 = por %p895_p1, %p894_p0 }
 0x137   : > { %p892_p13 = pneg %p891_p12 }
 0x139   : > { %p897_p3 = pnand %p896_p2, %p892_p13 }
 0x180   : > { %v558_v22 = vpop.permute.xlu2 %557 }
 0x188   : > { %v576_v35 = vpop.permute.xlu2 %575 }
 0x198   : > { %v560_v26 = vpop.permute.xlu0 %559 }
 0x199   : > { %v562_v28 = vsel %vm561_vm4, %v558_v22, %v560_v26  ;;  %v563_v30 = vsel %vm561_vm4, %v560_v26, %v558_v22 }
 0x19a   : > { %v569_v31 = vmul.f32 %v565_v24, %v563_v30  ;;  %v570_v32 = vmul.f32 %v566_v25, %v562_v28 }
 0x19c   : > { %v571_v39 = vadd.f32 %v569_v31, %v494_v16  ;;  %v572_v40 = vadd.f32 %v570_v32, %v495_v21 }
 0x19d   : > { %v574_v36 = vpop.permute.xlu1 %573 }
 0x19e   : > { %v578_v37 = vsel %vm577_vm5, %v574_v36, %v576_v35  ;;  %v579_v38 = vsel %vm577_vm5, %v576_v35, %v574_v36 }
 0x19f   : > { %v585_v41 = vmul.f32 %v581_v33, %v578_v37  ;;  %v586_v42 = vmul.f32 %v582_v34, %v579_v38 }
 0x1a0   : > { %v593_v45 = vpop.permute.xlu0 %592 }
 0x1a1   : > { %v587_v43 = vadd.f32 %v585_v41, %v571_v39  ;;  %v588_v44 = vadd.f32 %v586_v42, %v572_v40 }
 0x1a3   : > { %v595_v46 = vadd.f32 %v593_v45, %v587_v43  ;;  %v596_v47 = vadd.f32 %v593_v45, %v588_v44 }
 0x1a5   : > { %v598_v48 = vpack.c.bf16 %v595_v46, %v595_v46  ;;  %v599_v29 = vpack.c.bf16 %v596_v47, %v596_v47  ;;  %v604_v52 = vpop.permute.xlu1 %603 }
 0x1a7   : > { %v610_v49 = vsel %vm395_vm0, %v598_v48, 0  ;;  %v613_v50 = vsel %vm395_vm0, %v599_v29, 0 }
 0x1a8   : > { %622 = vmatpush.bf16.msra.mxu2 %v610_v49  ;;  %635 = vmatpush.bf16.msra.mxu3 %v613_v50 }
 0x1ab   : > { %817 = vmatmul.msk.bf16.vlgmr.msra.gmra.mxu2 %vm391_vm1, %v597_v51  ;;  %818 = vmatmul.msk.bf16.vlgmr.msra.gmra.mxu3 %vm391_vm1, %v597_v51 }
 0x22e   : > { %v624_v53 = vpop.f32.mrf.mxu2  ;;  %v637_v54 = vpop.f32.mrf.mxu3 }
 0x22f   : > { %v625_v55 = vadd.f32 %v624_v53, %v604_v52  ;;  %v638_v56 = vadd.f32 %v637_v54, %v604_v52 }
 0x231   : > { %641 = vst [vmem:[%s353_s29] sm:$0xff] %v625_v55  ;;  %v643_v57 = vadd.f32 %v638_v56, %v625_v55 }
 0x232   : > { %642 = vst [vmem:[%s353_s29 + $0x8] sm:$0xff] %v638_v56 }
 0x233   : > { %644 = vadd.xlane.f32.xlu2 %v643_v57 }
 0x236   : > { %v626_v58 = vpop.f32.mrf.mxu2  ;;  %v639_v59 = vpop.f32.mrf.mxu3 }
 0x2a6   : > { %v645_v60 = vpop.xlane.xlu2 %644 }
 0x2a7   : > { %900 = shalt.err (!%p897_p3)
}
 0x2a8   : > { %826 = dma.vmem_to_hbm [thread:$0]  (%p1035_p5), %s680_s1, 256, %s682_s28, %s658_s2   ;;  %v646_v61 = vmul.f32 0.00390625, %v645_v60  ;;  %650 = vst.msk [vmem:[%s374_s20] sm:$0xff] %vm649_vm6, %v645_v60 }
 0x2a9   : > { %s378_s4 = scalar_lea.vmem %s1190_s10, %s802_s11 }
 0x2aa   : > { %v647_v62 = vsub.f32 %v625_v55, %v646_v61  ;;  %v648_v63 = vsub.f32 %v638_v56, %v646_v61 }
 0x2ac   : > { %v651_v0 = vmul.f32 %v647_v62, %v647_v62  ;;  %v652_v1 = vmul.f32 %v648_v63, %v648_v63 }
 0x2ae   : > { %v653_v2 = vadd.f32 %v652_v1, %v651_v0 }
 0x2b0   : > { %654 = vadd.xlane.f32.xlu0 %v653_v2 }
 0x323   : > { %v655_v3 = vpop.xlane.xlu0 %654 }
 0x324   : > { %656 = vst.msk [vmem:[%s378_s4] sm:$0xff] %vm649_vm6, %v655_v3 }
 0x325 PF: > { %p832_p4 = scmp.ge.s32.totalorder %s935_s16, 2  ;;  %s699_s1 = sand.u32 1, %s923_s13  }
 0x326   : > { %s700_s2 = scalar_lea.sflag [#allocation3], %s699_s1 }
 0x327   : > { %p829_p5 = pnand %p832_p4, %p1039_p6 }
 0x329   : > { %p830_p7 = pneg %p829_p5 }
 0x32b   : > { %918 = dma.done.wait (%p830_p7), %s700_s2, 256  }
 0x32c   : > { %920 = vsyncadd (%p830_p7), %s700_s2, 4294967040  ;;  %p21_p8 = scmp.ge.s32.totalorder %s1022_s19, 4   ;;  %s1203_s13 = smov %s927_s14 }
 0x32d   : > { %s1204_s14 = smov %s931_s15  ;;  %s1205_s15 = smov %s1033_s22 }
 0x32e   : > { %s1206_s16 = smov %s1022_s19  ;;  %23 = sbr.rel (!%p21_p8) target bundleno = 9 (0x9), region = 122 }
 0x333   :  { %720 = vsyncpa [#allocation3], 1 }
 0x334   :  { %722 = vsyncpa [#allocation3 + $0x1], 1 }

</bundles_post_ra>
